<compile_context>
chip_gen: v7x
topology: tpu7x:2x2x1
jax: 0.10.0
libtpu: 0.0.40
codegen_flags: <defaults>
</compile_context>

<pallas_src>
from math import isqrt

import numpy as np
import jax
import jax.numpy as jnp
from jax.experimental import pallas as pl
from jax.experimental.pallas import tpu as pltpu


# ---------------------------------------------------------------------------
# Fused Pallas kernel: level-0 embedding + concat of streamed coarse levels.
# ---------------------------------------------------------------------------
def _make_kernel(depth, e_per_level):
    E = e_per_level

    def kernel(*refs):
        p0_ref = refs[0]                  # (1, TN, K0) bf16 level-0 patches
        up_refs = refs[1:depth]           # (1, TN, E) bf16 coarse contributions
        w0_ref = refs[depth]              # (K0, E)  bf16 level-0 weights
        b0_ref = refs[depth + 1]          # (1, E)   f32 level-0 bias
        o_ref = refs[depth + 2]           # (1, TN, E*depth) output tile

        # Level-0 patch embedding: bf16 MXU matmul, f32 accumulation, bias once.
        lvl0 = jnp.dot(p0_ref[0], w0_ref[...],
                       preferred_element_type=jnp.float32) + b0_ref[...]
        o_ref[0, :, 0:E] = lvl0.astype(o_ref.dtype)

        # Coarse levels: precomputed & already resampled to N tokens; placing
        # each into its own column block IS the channel-wise concatenation.
        for i in range(1, depth):
            o_ref[0, :, i * E:(i + 1) * E] = up_refs[i - 1][0].astype(o_ref.dtype)

    return kernel


def _pick_token_tile(n, per_token_bytes, budget_bytes):
    """Largest power-of-two token tile that divides N and fits the VMEM budget
    (budget kept conservative so it also fits v7x's smaller VMEM)."""
    for cand in (1024, 512, 256, 128, 64, 32, 16, 8):
        if cand <= n and n % cand == 0 and cand * per_token_bytes <= budget_bytes:
            return cand
    return n


def hierarchical_embed_pallas(p0, ups, w0, b0, *, out_dtype=jnp.float32,
                              token_tile=None,
                              vmem_limit_bytes=48 * 1024 * 1024,
                              tile_budget_bytes=16 * 1024 * 1024):
    """Fused hierarchical embedding.

    p0 : (B, N, K0)  bf16 level-0 patches in zigzag token order
    ups: list of (B, N, E) bf16 coarse-level contributions (embed + bias +
         linear resample already applied, zigzag order)
    w0 : (K0, E) bf16 level-0 conv-as-matmul weights
    b0 : (1, E)  f32 level-0 bias
    returns (B, N, E*depth) out_dtype
    """
    depth = 1 + len(ups)
    B, N, K0 = p0.shape
    E = w0.shape[1]
    Etot = E * depth

    # VMEM accounting per token row (double-buffered inputs + output tile).
    per_token = 2 * K0 * p0.dtype.itemsize
    for u in ups:
        per_token += 2 * E * u.dtype.itemsize
    per_token += 2 * Etot * jnp.dtype(out_dtype).itemsize
    TN = token_tile if token_tile is not None else _pick_token_tile(
        N, per_token, tile_budget_bytes)
    assert N % TN == 0
    NT = N // TN

    in_specs = [pl.BlockSpec((1, TN, K0), lambda b, n: (b, n, 0))]
    for _ in ups:
        in_specs.append(pl.BlockSpec((1, TN, E), lambda b, n: (b, n, 0)))
    # Grid-constant operands (tiny).
    # TODO(synk): single-buffer these via pipeline_mode=pl.Buffered(1) to
    # reclaim VMEM on v7x (they never change block index across the grid).
    in_specs.append(pl.BlockSpec((K0, E), lambda b, n: (0, 0)))
    in_specs.append(pl.BlockSpec((1, E), lambda b, n: (0, 0)))

    return pl.pallas_call(
        _make_kernel(depth, E),
        out_shape=jax.ShapeDtypeStruct((B, N, Etot), out_dtype),
        grid=(B, NT),
        in_specs=in_specs,
        out_specs=pl.BlockSpec((1, TN, Etot), lambda b, n: (b, n, 0)),
        compiler_params=pltpu.CompilerParams(
            dimension_semantics=("parallel", "parallel"),
            vmem_limit_bytes=vmem_limit_bytes,
        ),
    )(p0, *ups, w0, b0)


# ---------------------------------------------------------------------------
# Glue: patch extraction (zigzag), 2-tap linear resample
# ---------------------------------------------------------------------------
def extract_patches(x, patch, zigzag):
    """x: (B, C, H, W) -> (B, gh*gw, C*patch*patch).  Tokens in raster order,
    or zigzag (even grid rows L->R, odd rows R->L) if zigzag=True.  The zigzag
    is a flip+select so XLA can fuse it into the im2col transpose copy.
    TODO(synk): verify in HLO this fuses; otherwise fold the flip in-kernel."""
    B, C, H, W = x.shape
    gh, gw = H // patch, W // patch
    p = x.reshape(B, C, gh, patch, gw, patch)
    p = p.transpose(0, 2, 4, 1, 3, 5).reshape(B, gh, gw, C * patch * patch)
    if zigzag:
        odd = (jnp.arange(gh) % 2 == 1)[None, :, None, None]
        p = jnp.where(odd, p[:, :, ::-1, :], p)
    return p.reshape(B, gh * gw, C * patch * patch)


def linear_resample(emb, n_out):
    """emb: (B, L, E) f32 -> (B, n_out, E).  PyTorch 1-D linear interpolation
    (align_corners=False) expressed as a 2-tap gather + lerp (each output row
    has exactly two nonzero weights, and they sum to 1)."""
    B, L, E = emb.shape
    if L == n_out:
        return emb
    scale = L / n_out
    src = np.maximum(scale * (np.arange(n_out, dtype=np.float64) + 0.5) - 0.5, 0.0)
    i0 = np.minimum(np.floor(src).astype(np.int32), L - 1)
    i1 = np.minimum(i0 + 1, L - 1)
    lam = jnp.asarray((src - i0).astype(np.float32))[None, :, None]
    g0 = jnp.take(emb, jnp.asarray(i0), axis=1)
    g1 = jnp.take(emb, jnp.asarray(i1), axis=1)
    return g0 * (1.0 - lam) + g1 * lam


# ---------------------------------------------------------------------------
# Module port
# ---------------------------------------------------------------------------
class HierarchicalZigzagEmbeddingPallas:
    def __init__(self, img_size, in_channels, patch_size_list, embed_dim, key,
                 compute_dtype=jnp.bfloat16, out_dtype=jnp.float32):
        self.img_size = img_size
        self.in_channels = in_channels
        self.compute_dtype = compute_dtype
        self.out_dtype = out_dtype          # pass bf16 in production (item 9)
        self.depth = len(patch_size_list)
        self.embed_dim_per_level = embed_dim
        self.embed_dim = embed_dim * self.depth

        # ---- per-level conv-as-matmul parameters (PyTorch Conv2d default init)
        self.level_params = []     # (eff_patch, w (K,E) f32, bias (E,) f32)
        pre, pre_list = 1, []
        for gp in patch_size_list:
            eff = pre * isqrt(gp)                       # effective pixel patch side
            K = in_channels * eff * eff
            key, kw, kb = jax.random.split(key, 3)
            bound = 1.0 / np.sqrt(K)
            w_conv = jax.random.uniform(kw, (embed_dim, in_channels, eff, eff),
                                        jnp.float32, -bound, bound)
            b = jax.random.uniform(kb, (embed_dim,), jnp.float32, -bound, bound)
            self.level_params.append((eff, w_conv.reshape(embed_dim, K).T, b))
            pre_list.append(pre)
            pre *= 2

        self.patch_list = [int((img_size // p // isqrt(gp)) ** 2)
                           for p, gp in zip(pre_list, patch_size_list)]
        self.n_patches = self.patch_list[0]

        # Kernel-ready level-0 params (unpadded — review item 1).
        self.w0 = self.level_params[0][1].astype(compute_dtype)   # (K0, E) bf16
        self.b0 = self.level_params[0][2][None, :]                # (1, E) f32

    # -----------------------------------------------------------------
    def __call__(self, x):
        # x: (B, C, H, W)
        eff0 = self.level_params[0][0]
        p0 = extract_patches(x, eff0, zigzag=True).astype(self.compute_dtype)

        # Coarse levels: embed once per batch (L_i tokens only), add bias,
        # 2-tap linear resample to N tokens, stream into the kernel as bf16.
        ups = []
        for i in range(1, self.depth):
            eff, w, b = self.level_params[i]
            p = extract_patches(x, eff, zigzag=True).astype(self.compute_dtype)
            emb = jnp.einsum("blk,ke->ble", p, w.astype(self.compute_dtype),
                             preferred_element_type=jnp.float32) + b[None, None, :]
            up = linear_resample(emb, self.n_patches)
            ups.append(up.astype(self.compute_dtype))

        return hierarchical_embed_pallas(p0, ups, self.w0, self.b0,
                                         out_dtype=self.out_dtype)

    # -----------------------------------------------------------------
    def reference(self, x):
        """Pure-JAX reference of the original un-fused math (zigzag patches per
        level -> embed -> interpolate -> concat), f32 interpolation/concat,
        same bf16-input / f32-accumulation matmul numerics."""
        outs = []
        for i, (eff, w, b) in enumerate(self.level_params):
            patches = extract_patches(x, eff, zigzag=True).astype(self.compute_dtype)
            tok = jnp.einsum("bnk,ke->bne", patches, w.astype(self.compute_dtype),
                             preferred_element_type=jnp.float32) + b[None, None, :]
            if i > 0:
                tok = linear_resample(tok, self.n_patches)
            outs.append(tok)
        return jnp.concatenate(outs, axis=-1)


# ---------------------------------------------------------------------------
# main
# ---------------------------------------------------------------------------
if __name__ == "__main__":
    key = jax.random.PRNGKey(0)
    key, kx, kparams = jax.random.split(key, 3)

    img_size = 16
    in_channels = 4
    patch_size_list = [4, 16]   # level 0: eff patch 2 -> 64 tokens; level 1: eff patch 8 -> 4 tokens
    embed_dim = 32
    batch = 2

    x = jax.random.normal(kx, (batch, in_channels, img_size, img_size), jnp.float32)

    model = HierarchicalZigzagEmbeddingPallas(img_size, in_channels, patch_size_list,
                                              embed_dim, kparams)

    out = jax.block_until_ready(model(x))

    expected_shape = (batch, model.n_patches, model.embed_dim)   # (2, 64, 64)
    assert out.shape == expected_shape, (out.shape, expected_shape)

    ref = jax.block_until_ready(model.reference(x))
    max_err = float(jnp.max(jnp.abs(out - ref)))
    # Coarse-level contributions are streamed into the kernel as bf16
    # (production-sane); tolerance accounts for that rounding only.
    assert jnp.allclose(out, ref, atol=1e-2, rtol=1e-2), f"mismatch vs reference, max_err={max_err}"

    print("KERNEL_OK")
</pallas_src>

<mosaic_0001>
module attributes {stable_mosaic.version = 11 : i64} {
  func.func @kernel(%arg0: i32, %arg1: i32, %arg2: memref<1x64x16xbf16, #tpu.memory_space<vmem>>, %arg3: memref<1x64x32xbf16, #tpu.memory_space<vmem>>, %arg4: memref<16x32xbf16, #tpu.memory_space<vmem>>, %arg5: memref<1x32xf32, #tpu.memory_space<vmem>>, %arg6: memref<1x64x64xf32, #tpu.memory_space<vmem>>) attributes {dimension_semantics = [#tpu.dimension_semantics<parallel>, #tpu.dimension_semantics<parallel>], iteration_bounds = array<i64: 2, 1>, scalar_prefetch = 0 : i64, scratch_operands = 0 : i64, tpu.core_type = #tpu.core_type<tc>, window_params = [{transform_indices = @transform_0, window_bounds = array<i64: 1, 64, 16>}, {transform_indices = @transform_1, window_bounds = array<i64: 1, 64, 32>}, {pipeline_mode = #tpu.pipeline_mode<synchronous>, transform_indices = @transform_2, window_bounds = array<i64: 16, 32>}, {pipeline_mode = #tpu.pipeline_mode<synchronous>, transform_indices = @transform_3, window_bounds = array<i64: 1, 32>}, {transform_indices = @transform_4, window_bounds = array<i64: 1, 64, 64>}]} {
    %c0 = arith.constant 0 : index
    %c0_0 = arith.constant 0 : index
    %c0_1 = arith.constant 0 : index
    %0 = vector.load %arg2[%c0, %c0_0, %c0_1] : memref<1x64x16xbf16, #tpu.memory_space<vmem>>, vector<1x64x16xbf16>
    %1 = vector.shape_cast %0 : vector<1x64x16xbf16> to vector<64x16xbf16>
    %c0_2 = arith.constant 0 : index
    %c0_3 = arith.constant 0 : index
    %2 = vector.load %arg4[%c0_2, %c0_3] : memref<16x32xbf16, #tpu.memory_space<vmem>>, vector<16x32xbf16>
    %cst = arith.constant dense<0.000000e+00> : vector<64x32xf32>
    %3 = tpu.matmul %1, %2, %cst {dimension_numbers = #tpu.dot_dimension_numbers<[1], [0], [0], [1], [0, 0, 1, 1], [], []>} : vector<64x16xbf16>, vector<16x32xbf16>, vector<64x32xf32> -> vector<64x32xf32>
    %c0_4 = arith.constant 0 : index
    %c0_5 = arith.constant 0 : index
    %4 = vector.load %arg5[%c0_4, %c0_5] : memref<1x32xf32, #tpu.memory_space<vmem>>, vector<1x32xf32>
    %5 = vector.broadcast %4 : vector<1x32xf32> to vector<64x32xf32>
    %6 = arith.addf %3, %5 : vector<64x32xf32>
    %c0_6 = arith.constant 0 : index
    %c0_7 = arith.constant 0 : index
    %c0_8 = arith.constant 0 : index
    %7 = vector.load %arg6[%c0_6, %c0_7, %c0_8] : memref<1x64x64xf32, #tpu.memory_space<vmem>>, vector<1x64x32xf32>
    %8 = vector.shape_cast %7 : vector<1x64x32xf32> to vector<64x32xf32>
    %9 = vector.shape_cast %6 : vector<64x32xf32> to vector<1x64x32xf32>
    tpu.vector_store %arg6[%c0_6, %c0_7, %c0_8], %9 {strides = array<i32>} : memref<1x64x64xf32, #tpu.memory_space<vmem>>, vector<1x64x32xf32>,
    %c0_9 = arith.constant 0 : index
    %c0_10 = arith.constant 0 : index
    %c0_11 = arith.constant 0 : index
    %10 = vector.load %arg3[%c0_9, %c0_10, %c0_11] : memref<1x64x32xbf16, #tpu.memory_space<vmem>>, vector<1x64x32xbf16>
    %11 = vector.shape_cast %10 : vector<1x64x32xbf16> to vector<64x32xbf16>
    %12 = arith.extf %11 : vector<64x32xbf16> to vector<64x32xf32>
    %c0_12 = arith.constant 0 : index
    %c0_13 = arith.constant 0 : index
    %c32 = arith.constant 32 : index
    %13 = vector.load %arg6[%c0_12, %c0_13, %c32] : memref<1x64x64xf32, #tpu.memory_space<vmem>>, vector<1x64x32xf32>
    %14 = vector.shape_cast %13 : vector<1x64x32xf32> to vector<64x32xf32>
    %15 = vector.shape_cast %12 : vector<64x32xf32> to vector<1x64x32xf32>
    tpu.vector_store %arg6[%c0_12, %c0_13, %c32], %15 {strides = array<i32>} : memref<1x64x64xf32, #tpu.memory_space<vmem>>, vector<1x64x32xf32>,
    return
  }
  func.func @transform_0(%arg0: i32, %arg1: i32) -> (i32, i32, i32) {
    %c0_i32 = arith.constant 0 : i32
    %c0_i32_0 = arith.constant 0 : i32
    return %arg0, %arg1, %c0_i32 : i32, i32, i32
  }
  func.func @transform_1(%arg0: i32, %arg1: i32) -> (i32, i32, i32) {
    %c0_i32 = arith.constant 0 : i32
    %c0_i32_0 = arith.constant 0 : i32
    return %arg0, %arg1, %c0_i32 : i32, i32, i32
  }
  func.func @transform_2(%arg0: i32, %arg1: i32) -> (i32, i32) {
    %c0_i32 = arith.constant 0 : i32
    %c0_i32_0 = arith.constant 0 : i32
    %c0_i32_1 = arith.constant 0 : i32
    return %c0_i32, %c0_i32_0 : i32, i32
  }
  func.func @transform_3(%arg0: i32, %arg1: i32) -> (i32, i32) {
    %c0_i32 = arith.constant 0 : i32
    %c0_i32_0 = arith.constant 0 : i32
    %c0_i32_1 = arith.constant 0 : i32
    return %c0_i32, %c0_i32_0 : i32, i32
  }
  func.func @transform_4(%arg0: i32, %arg1: i32) -> (i32, i32, i32) {
    %c0_i32 = arith.constant 0 : i32
    %c0_i32_0 = arith.constant 0 : i32
    return %arg0, %arg1, %c0_i32 : i32, i32, i32
  }
}

</mosaic_0001>

<bundles_post_ra>
// kernel: tpu_custom_call.1
= control target key start
LH: loop header
LB: loop body
LE: loop exit
PB: predicated region body
PF: predicated region fallthrough
CT: control target
= control target key end

     0   :  { %9 = vsyncpa [#allocation3], 0  ;;  %s983_s0 = inlined_call_operand.vmem [shape: bf16[2,64,16], index: 0, kind: input, shape index: {}]   ;;  %s984_s1 = inlined_call_operand.vmem [shape: bf16[2,64,32], index: 1, kind: input, shape index: {}]   ;;  %s985_s2 = inlined_call_operand.vmem [shape: bf16[16,32], index: 2, kind: input, shape index: {}]   ;;  %s986_s3 = inlined_call_operand.vmem [shape: f32[1,32], index: 3, kind: input, shape index: {}]   ;;  %s987_s4 = inlined_call_operand.hbm [shape: f32[2,64,64], index: 4, kind: output, shape index: {}]  }
   0x1   :  { %11 = vsyncpa [#allocation3 + $0x1], 0  ;;  %s820_s15 = smov 0   ;;  %s822_s16 = smov 0  }
   0x2   :  { %s824_s17 = smov 0   ;;  %s826_s18 = smov 0  }
   0x3   :  { %s828_s19 = smov 0   ;;  %s830_s20 = smov 0  }
   0x4 LB: > { %s564_s21 = sadd.s32 4294967295, %s789_s20   ;;  %s565_s22 = sadd.s32 4294967294, %s789_s20   ;;  %s789_s20 = sphi %s830_s20, %s17_s20   ;;  %s785_s19 = sphi %s828_s19, %s994_s19   ;;  %s781_s18 = sphi %s826_s18, %s993_s18   ;;  %s777_s17 = sphi %s824_s17, %s992_s17   ;;  %s773_s16 = sphi %s822_s16, %s991_s16   ;;  %s769_s15 = sphi %s820_s15, %s990_s15  }
   0x5   : > { %s29_s23 = sadd.s32 1, %s785_s19  ;;  %s136_s24 = sadd.s32 1, %s777_s17 }
   0x6   : > { %p31_p0 = scmp.ge.s32.totalorder %s29_s23, 2  ;;  %p146_p1 = scmp.ne.s32.totalorder %s777_s17, %s773_s16 }
   0x7   : > { %p147_p2 = scmp.eq.s32.totalorder %s564_s21, 1  ;;  %p152_p3 = scmp.ne.s32.totalorder %s773_s16, %s769_s15 }
   0x8   : > { %s996_s23 = smov (%p31_p0, %s29_s23), 0  ;;  %p153_p5 = scmp.eq.s32.totalorder %s565_s22, 1 }
   0x9   : > { %p860_p4 = por %p147_p2, %p146_p1  ;;  %s131_s26 = ssub.s32 %s785_s19, %s996_s23 }
   0xa   : > { %p568_p6 = scmp.ge.s32.totalorder %s789_s20, 1  ;;  %p134_p7 = scmp.eq.s32.totalorder %s131_s26, 0 }
   0xb   : > { %p867_p8 = por %p153_p5, %p152_p3  ;;  %p203_p9 = scmp.lt.s32.totalorder %s789_s20, 3 }
   0xc   : > { %s873_s28 = scalar_select %p134_p7, %s777_s17, %s136_s24  }
   0xd   : > { %p204_p10 = pnand %p568_p6, %p203_p9 }
   0xe   : > { %v706_v0 = vld [vmem:[%s985_s2] sm:$0xff] (!%p204_p10)   ;;  %p243_p11 = scmp.lt.s32.totalorder (!%p204_p10), %s781_s18, 1  ;;  %vm307_vm0 = vcmask (!%p204_p10), 130048   ;;  %s791_s13 = smov (!%p204_p10), 32   ;;  %vm385_vm1 = vcmask (!%p204_p10), 261120   ;;  %vm442_vm2 = vcmask (!%p204_p10), 523520  }
   0xf   : > { %207 = sbr.rel (%p204_p10) target bundleno = 264 (0x108), region = 36  ;;  %616 = vmatprep.subr.bf16.mxu0 (!%p204_p10), %v706_v0  ;;  %626 = vmatprep.subr.bf16.mxu1 (!%p204_p10), %v706_v0  ;;  %s239_s14 = sand.u32 (!%p204_p10), 1, %s773_s16   ;;  %v574_v24 = vld [vmem:[%s986_s3] ss:$0 sm:$0xff] (!%p204_p10) }
  0x10   : > { %617 = vmatpush3.bf16.msra.mxu0 (!%p204_p10), %v706_v0  ;;  %627 = vmatpush3.bf16.msra.mxu1 (!%p204_p10), %v706_v0  ;;  %s569_s21 = sshll.u32 (!%p204_p10), %s239_s14, 6  ;;  %s591_s26 = sshll.u32 (!%p204_p10), %s781_s18, 10 }
  0x11   : > { %s893_s29 = scalar_lea.vmem (!%p204_p10), [#allocation2], %s569_s21  ;;  %s937_s7 = scalar_lea.sflag (!%p204_p10), [#allocation3], %s239_s14 }
  0x12   : > { %s467_s30 = sshll.u32 (!%p204_p10), %s893_s29, 4  ;;  %s917_s30 = int_to_ptr.vmem [resolvable:$true] %s467_s30 }
  0x13   : > { %s711_s8 = scalar_lea.vmem (!%p204_p10), %s917_s30, 1024 }
  0x14   : > { %p712_p12 = scmp.ne.s32.totalorder (!%p204_p10), %s917_s30, %s711_s8 }
  0x16   : > { %s244_s5 = scalar_select %p243_p11, %s781_s18, 1 }
  0x17   : > { %p713_p13 = pnand %p712_p12, %p860_p4 }
  0x18   : > { %s589_s6 = sshll.u32 %s244_s5, 5 }
  0x19   : > { %s250_s9 = scalar_lea.vmem %s983_s0, %s589_s6  ;;  %s260_s12 = scalar_lea.vmem %s984_s1, %s589_s6 }
  0x1a   : > { %v707_v1 = vld [vmem:[%s250_s9] sm:$0xff]   ;;  %v708_v2 = vld [vmem:[%s250_s9 + $0x10] sm:$0xff]   ;;  %v709_v3 = vld [vmem:[%s250_s9 + $0x8] sm:$0xff]   ;;  %s915_s6 = scalar_lea.hbm %s987_s4, %s591_s26  ;;  %p714_p0 = pneg %p713_p13 }
  0x1b   : > { %618 = vmatprep.mubr.msk.bf16.mxu0 %vm307_vm0, %v707_v1  ;;  %622 = vmatprep.mubr.msk.bf16.mxu1 %vm307_vm0, %v708_v2  ;;  %v710_v4 = vld [vmem:[%s250_s9 + $0x18] sm:$0xff]   ;;  %v609_v5 = vld [vmem:[%s260_s12 + $0x10] sm:$0xff]   ;;  %v593_v6 = vld [vmem:[%s260_s12] sm:$0xff]   ;;  %s792_s9 = smov [#allocation2]  }
  0x1c   : > { %619 = vmatmul.mubr.msk.bf16.vlgmr.msra.gmra.mrb[0].mxu0 %vm307_vm0, %v709_v3  ;;  %v610_v7 = vld [vmem:[%s260_s12 + $0x18] sm:$0xff]   ;;  %623 = vmatmul.mubr.msk.bf16.vlgmr.msra.gmra.mrb[0].mxu1 %vm307_vm0, %v710_v4  ;;  %v602_v8 = vunpack.c.l.bf16 %v609_v5  ;;  %v603_v9 = vunpack.c.h.bf16 %v609_v5  ;;  %v594_v10 = vunpack.c.l.bf16 %v593_v6  ;;  %v595_v11 = vunpack.c.h.bf16 %v593_v6  ;;  %v608_v12 = vld [vmem:[%s260_s12 + $0x8] sm:$0xff]   ;;  %s715_s10 = sshll.u32 %s792_s9, 4  ;;  %s716_s10 = int_to_ptr.vmem [resolvable:$false] %s715_s10 }
  0x1d   : > { %v606_v13 = vunpack.c.l.bf16 %v610_v7  ;;  %v607_v14 = vunpack.c.h.bf16 %v610_v7  ;;  %v598_v15 = vunpack.c.l.bf16 %v608_v12  ;;  %v599_v16 = vunpack.c.h.bf16 %v608_v12  ;;  %s717_s11 = scalar_lea.vmem %s716_s10, 2048  ;;  %p718_p1 = scmp.lt.s32.totalorder %s917_s30, %s716_s10 }
  0x1e   : > { %v696_v17 = vpack.i.bf16 %v603_v9, %v602_v8  ;;  %v686_v18 = vpack.i.bf16 %v595_v11, %v594_v10  ;;  %p719_p2 = scmp.lt.s32.totalorder %s717_s11, %s711_s8 }
  0x1f   : > { %v701_v19 = vpack.i.bf16 %v607_v14, %v606_v13  ;;  %v691_v20 = vpack.i.bf16 %v599_v16, %v598_v15 }
  0x20   : > { %697 = vrot.lane.b32.xlu1 %v696_v17, %s791_s13  ;;  %687 = vrot.lane.b32.xlu0 %v686_v18, %s791_s13  ;;  %p720_p3 = por %p719_p2, %p718_p1 }
  0x22   : > { %p721_p5 = pnand %p720_p3, %p714_p0 }
  0x24   : > { %702 = vrot.lane.b32.xlu1 %v701_v19, %s791_s13  ;;  %692 = vrot.lane.b32.xlu0 %v691_v20, %s791_s13 }
  0x92   : > { %v688_v21 = vpop.permute.xlu0 %687  ;;  %v698_v22 = vpop.permute.xlu1 %697 }
  0x93   : > { %v689_v37 = vunpack.i.l.bf16 %v688_v21  ;;  %v699_v43 = vunpack.i.l.bf16 %v698_v22  ;;  %v690_v47 = vunpack.i.h.bf16 %v688_v21  ;;  %v700_v49 = vunpack.i.h.bf16 %v698_v22 }
  0x96   : > { %v693_v23 = vpop.permute.xlu0 %692  ;;  %v703_v25 = vpop.permute.xlu1 %702 }
  0x97   : > { %v694_v27 = vunpack.i.l.bf16 %v693_v23  ;;  %v704_v31 = vunpack.i.l.bf16 %v703_v25  ;;  %v695_v36 = vunpack.i.h.bf16 %v693_v23  ;;  %v705_v42 = vunpack.i.h.bf16 %v703_v25 }
  0xef   : > { %v620_v26 = vpop.f32.mrb[0].mxu0  ;;  %v624_v29 = vpop.f32.mrb[0].mxu1 }
  0xf0   : > { %v363_v28 = vadd.f32 %v620_v26, %v574_v24  ;;  %v354_v30 = vpop.f32.mrb[1].mxu0  ;;  %v379_v32 = vadd.f32 %v624_v29, %v574_v24  ;;  %v370_v34 = vpop.f32.mrb[1].mxu1 }
  0xf1   : > { %v355_v33 = vadd.f32 %v574_v24, %v354_v30  ;;  %v621_v35 = vpop.f32.mrb[2].mxu0  ;;  %v371_v38 = vadd.f32 %v574_v24, %v370_v34  ;;  %v625_v40 = vpop.f32.mrb[2].mxu1 }
  0xf2   : > { %388 = vst.msk [vmem:[%s893_s29 + $0x10] sm:$0xff] %vm385_vm1, %v363_v28  ;;  %v366_v39 = vadd.f32 %v621_v35, %v574_v24  ;;  %v357_v41 = vpop.f32.mrb[3].mxu0  ;;  %392 = vst.msk [vmem:[%s893_s29 + $0x30] sm:$0xff] %vm385_vm1, %v379_v32  ;;  %v382_v44 = vadd.f32 %v625_v40, %v574_v24  ;;  %v373_v46 = vpop.f32.mrb[3].mxu1 }
  0xf3   : > { %386 = vst.msk [vmem:[%s893_s29] sm:$0xff] %vm385_vm1, %v355_v33  ;;  %v358_v45 = vadd.f32 %v574_v24, %v357_v41  ;;  %390 = vst.msk [vmem:[%s893_s29 + $0x20] sm:$0xff] %vm385_vm1, %v371_v38  ;;  %v374_v48 = vadd.f32 %v574_v24, %v373_v46 }
  0xf4   : > { %445 = vst.msk [vmem:[%s893_s29 + $0x10] sm:$0xff] %vm442_vm2, %v694_v27  ;;  %443 = vst.msk [vmem:[%s893_s29] sm:$0xff] %vm442_vm2, %v689_v37 }
  0xf5   : > { %389 = vst.msk [vmem:[%s893_s29 + $0x18] sm:$0xff] %vm385_vm1, %v366_v39  ;;  %393 = vst.msk [vmem:[%s893_s29 + $0x38] sm:$0xff] %vm385_vm1, %v382_v44 }
  0xf6   : > { %449 = vst.msk [vmem:[%s893_s29 + $0x30] sm:$0xff] %vm442_vm2, %v704_v31  ;;  %447 = vst.msk [vmem:[%s893_s29 + $0x20] sm:$0xff] %vm442_vm2, %v699_v43 }
  0xf7   : > { %387 = vst.msk [vmem:[%s893_s29 + $0x8] sm:$0xff] %vm385_vm1, %v358_v45  ;;  %391 = vst.msk [vmem:[%s893_s29 + $0x28] sm:$0xff] %vm385_vm1, %v374_v48 }
  0xf8   : > { %446 = vst.msk [vmem:[%s893_s29 + $0x18] sm:$0xff] %vm442_vm2, %v695_v36  ;;  %444 = vst.msk [vmem:[%s893_s29 + $0x8] sm:$0xff] %vm442_vm2, %v690_v47 }
  0xf9   : > { %450 = vst.msk [vmem:[%s893_s29 + $0x38] sm:$0xff] %vm442_vm2, %v705_v42  ;;  %448 = vst.msk [vmem:[%s893_s29 + $0x28] sm:$0xff] %vm442_vm2, %v700_v49 }
  0xfa   : > { %724 = shalt.err (!%p721_p5)
}
  0xfb   : > { %s725_s12 = scalar_lea.hbm %s915_s6, 1024  ;;  %s729_s21 = scalar_lea.hbm %s987_s4, 2048 }
  0xfc   : > { %p726_p6 = scmp.ne.s32.totalorder %s915_s6, %s725_s12  ;;  %p730_p10 = scmp.lt.u32.totalorder %s915_s6, %s987_s4 }
  0xfd   : > { %p731_p11 = scmp.lt.u32.totalorder %s729_s21, %s725_s12  ;;  %p733_p13 = scmp.lt.u32.totalorder %s725_s12, %s915_s6 }
  0xfe   : > { %p727_p7 = pnand %p726_p6, %p860_p4 }
  0xff   : > { %p732_p12 = por %p731_p11, %p730_p10 }
 0x100   : > { %p728_p9 = pneg %p727_p7 }
 0x101   : > { %p734_p0 = por %p733_p13, %p732_p12 }
 0x103   : > { %p735_p1 = pnand %p734_p0, %p728_p9 }
 0x105   : > { %738 = shalt.err (!%p735_p1)
}
 0x106   : > { %s793_s26 = smov 128   ;;  %s794_s29 = smov 8  }
 0x107   : > { %628 = dma.vmem_to_hbm [thread:$0]  (%p860_p4), %s917_s30, 1024, %s915_s6, %s937_s7, %s793_s26, %s793_s26, %s794_s29  }
 0x108 PF: > { %p634_p2 = scmp.ge.s32.totalorder %s789_s20, 2  ;;  %s482_s18 = sand.u32 1, %s769_s15  }
 0x109   : > { %s483_s5 = scalar_lea.sflag [#allocation3], %s482_s18 }
 0x10a   : > { %p631_p3 = pnand %p634_p2, %p867_p8 }
 0x10c   : > { %764 = dma.done.wait (!%p631_p3), %s483_s5, 1024  }
 0x10d   : > { %766 = vsyncadd (!%p631_p3), %s483_s5, 4294966272  ;;  %s17_s20 = sadd.s32 1, %s789_s20   ;;  %s990_s15 = smov %s773_s16 }
 0x10e   : > { %p14_p5 = scmp.ge.s32.totalorder %s17_s20, 4   ;;  %s991_s16 = smov %s777_s17 }
 0x10f   : > { %s992_s17 = smov %s873_s28  ;;  %s993_s18 = smov %s785_s19 }
 0x110   : > { %s994_s19 = smov %s996_s23  ;;  %16 = sbr.rel (!%p14_p5) target bundleno = 4 (0x4), region = 74 }
 0x117   :  { %488 = vsyncpa [#allocation3], 1 }
 0x118   :  { %490 = vsyncpa [#allocation3 + $0x1], 1 }

</bundles_post_ra>
